<compile_context>
chip_gen: v6e
topology: v6e:2x2x1
jax: 0.10.0
libtpu: 0.0.40
codegen_flags: <defaults>
</compile_context>

<pallas_src>
import functools

import numpy as np

import jax
import jax.numpy as jnp
from jax import lax
from jax.experimental import pallas as pl
from jax.experimental.pallas import tpu as pltpu


def _round_up(x: int, m: int) -> int:
    return (x + m - 1) // m * m


def multi_spline_kernel(tile_region_ref, coords_ref, const_ref, w_ref, out_ref,
                        *, n_coords, tk, nk):
    """One tile of tm fragments (single region): out_tile = A_hat @ W_region.

    A_hat is built in tk-column chunks (f32 VALU math), cast to bf16 and fed
    to the MXU; the (tm, D) accumulator stays f32."""
    del tile_region_ref      # consumed only by the weight BlockSpec index_map
    coords = coords_ref[...]                                    # (tm, C) f32, pre-clamped

    def body(k, acc):
        start = pl.multiple_of(k * tk, tk)
        cblk = const_ref[:, pl.ds(start, tk)]                   # (2, tk) f32
        centers = cblk[0:1, :]                                  # (1, tk)
        invbw = cblk[1:2, :]                                    # (1, tk)
        hat = None
        for c in range(n_coords):                               # static, C == 2
            dist = jnp.abs(coords[:, c:c + 1] - centers)        # (tm, tk)
            h = jnp.maximum(1.0 - dist * invbw, 0.0)            # triangular hat
            hat = h if hat is None else hat + h
        wblk = w_ref[pl.ds(start, tk), :]                       # (tk, D) bf16
        return acc + jnp.dot(hat.astype(jnp.bfloat16), wblk,
                             preferred_element_type=jnp.float32)

    acc = lax.fori_loop(0, nk, body,
                        jnp.zeros(out_ref.shape, jnp.float32), unroll=True)
    out_ref[...] = acc


def multi_spline_binary_encoding(coordinates, indptr, regions_oi, w, *,
                                 binwidths, window, tm=256):
    """coordinates: (N, C) integer cut-site coordinates.
       indptr:      (R+1,) fragment slice boundaries (concrete host values).
       regions_oi:  (R,)   region index per slice   (concrete host values).
       w:           (n_regions, nbins_total, D) float spline weights
                    (the FeatureParameter list stacked along axis 0).
       tm:          fragment tile rows (multiple of 8; ~512 on v6e/v7x,
                    256 on v5e).
       Returns (sum of slice lengths, D) float32 fragment embeddings."""
    coordinates = jnp.asarray(coordinates)
    N, C = coordinates.shape
    w = jnp.asarray(w, jnp.float32)
    n_regions, nbins_total, D = w.shape
    win_lo, win_hi = int(window[0]), int(window[1])

    assert tm % 8 == 0, "tm must be a multiple of 8 (sublane constraint)"
    assert max(abs(win_lo), abs(win_hi)) < 2 ** 24, \
        "coordinates must be exactly representable in f32"

    bw_np = np.asarray(binwidths, dtype=np.int64)
    binshifts = win_lo // bw_np                                  # floor division
    nbins = (win_hi - win_lo) // bw_np + 1
    bincumstarts = np.concatenate([np.zeros(1, np.int64), np.cumsum(nbins)[:-1]])
    assert int(nbins.sum()) == nbins_total, "w rows != sum of per-level bins"
    # The dense-hat formulation (and torch's idx+1 staying inside each level's
    # rows) requires each binwidth to tile the window exactly, as the module
    # defaults do.
    for bw in bw_np:
        assert (win_hi - 1) // bw - win_lo // bw + 1 <= (win_hi - win_lo) // bw, \
            f"binwidth {int(bw)} does not tile the window {window}"

    # ---- per-global-bin-column hat parameters + bf16 weight table ----------
    NB = _round_up(nbins_total, 128)          # lane-dense / MXU-friendly K dim
    tk = 512                                  # in-kernel K chunk (multiple of 128)
    while NB % tk:
        tk //= 2                              # 128 always divides NB
    nk = NB // tk

    const = np.zeros((2, NB), dtype=np.float32)
    const[0, :] = 1e9                         # padding columns: hat == 0
    const[1, :] = 1.0
    for b in range(len(bw_np)):
        s, n = int(bincumstarts[b]), int(nbins[b])
        const[0, s:s + n] = (np.arange(n) + int(binshifts[b])) * int(bw_np[b])
        const[1, s:s + n] = 1.0 / float(bw_np[b])

    # bf16 weight table (halves DMA/VMEM); pad rows are zero so padding
    # columns contribute nothing even if a hat value were nonzero there.
    w_pad = jnp.pad(w, ((0, 0), (0, NB - nbins_total), (0, 0))).astype(jnp.bfloat16)

    # ---- host-side tile schedule for the ragged (indptr, regions_oi) groups
    # TODO(synk): uses concrete indptr/regions_oi (numpy) at trace time; in a
    # fully jitted pipeline this schedule would be produced by the data loader.
    indptr_np = np.asarray(indptr, dtype=np.int64)
    regions_np = np.asarray(regions_oi, dtype=np.int64)
    merged = []                               # (start, end, region); order kept
    for k in range(len(regions_np)):
        s, e, r = int(indptr_np[k]), int(indptr_np[k + 1]), int(regions_np[k])
        if e <= s:
            continue
        if merged and merged[-1][2] == r and merged[-1][1] == s:
            merged[-1] = (merged[-1][0], e, r)     # merge consecutive same-region
        else:
            merged.append((s, e, r))
    if not merged:
        return jnp.zeros((0, D), jnp.float32)

    tile_region_parts, row_src_parts, segments = [], [], []
    t0 = 0
    for s, e, r in merged:
        cnt = e - s
        ntile = -(-cnt // tm)
        tile_region_parts.append(np.full((ntile,), r, np.int32))
        local = np.arange(ntile * tm)
        row_src_parts.append(s + np.minimum(local, cnt - 1))   # pad rows reuse a valid row
        segments.append((t0 * tm, cnt))                        # valid rows are contiguous
        t0 += ntile
    T = t0
    tile_region_np = np.concatenate(tile_region_parts)
    tile_region = jnp.asarray(tile_region_np)
    row_src = jnp.asarray(np.concatenate(row_src_parts).astype(np.int32))

    # Pre-clamp + cast on the host (no per-tile VPU clamp in the kernel).
    coords_f = jnp.clip(coordinates, win_lo, win_hi - 1).astype(jnp.float32)
    coords_pad = coords_f[row_src]                              # (T*tm, C)

    kernel = functools.partial(multi_spline_kernel, n_coords=C, tk=tk, nk=nk)

    n_wfetch = int(np.sum(tile_region_np[1:] != tile_region_np[:-1])) + 1
    flops = 2 * T * tm * NB * D + 5 * C * T * tm * NB
    bytes_accessed = (4 * T * tm * C + 4 * 2 * NB
                      + 2 * n_wfetch * NB * D + 4 * T * tm * D)

    vmem_bytes = (2 * NB * D * 2          # double-buffered bf16 weight block
                  + 2 * tm * D * 4        # double-buffered out block
                  + 2 * tm * C * 4        # double-buffered coords block
                  + 2 * 2 * NB * 4        # const block
                  + tm * tk * 4           # live hat chunk
                  + tm * D * 4)           # f32 accumulator
    vmem_limit = int(min(max(4 * vmem_bytes, 16 << 20), 48 << 20))

    out_pad = pl.pallas_call(
        kernel,
        out_shape=jax.ShapeDtypeStruct((T * tm, D), jnp.float32),
        grid_spec=pltpu.PrefetchScalarGridSpec(
            num_scalar_prefetch=1,
            grid=(T,),
            in_specs=[
                pl.BlockSpec((tm, C), lambda i, tr: (i, 0)),            # coords tile
                pl.BlockSpec((2, NB), lambda i, tr: (0, 0)),            # centers / 1/bw
                pl.BlockSpec((None, NB, D), lambda i, tr: (tr[i], 0, 0)),  # region W (bf16)
            ],
            out_specs=pl.BlockSpec((tm, D), lambda i, tr: (i, 0)),
        ),
        compiler_params=pltpu.CompilerParams(
            dimension_semantics=("parallel",),
            vmem_limit_bytes=vmem_limit),
        cost_estimate=pl.CostEstimate(flops=int(flops), transcendentals=0,
                                      bytes_accessed=int(bytes_accessed)),
    )(tile_region, coords_pad, jnp.asarray(const), w_pad)

    # Epilogue: valid rows of each merged slice are a contiguous prefix of its
    # tiles -> static slices concatenated in slice order (no gather, no padded
    # lanes since D was never padded).
    if len(segments) == 1:
        off, cnt = segments[0]
        return out_pad[off:off + cnt]
    return jnp.concatenate([out_pad[off:off + cnt] for off, cnt in segments],
                           axis=0)


def multi_spline_ref(coordinates, indptr, regions_oi, w, *, binwidths, window):
    """Numpy port of MultiSplineBinaryEncoding.forward (torch semantics)."""
    coordinates = np.asarray(coordinates, np.int64)
    indptr = np.asarray(indptr, np.int64)
    regions_oi = np.asarray(regions_oi, np.int64)
    w = np.asarray(w, np.float64)
    bw = np.asarray(binwidths, np.int64)
    D = w.shape[-1]
    binshifts = window[0] // bw
    nbins = (window[1] - window[0]) // bw + 1
    bincumstarts = np.concatenate([np.zeros(1, np.int64), np.cumsum(nbins)[:-1]])
    coords = np.clip(coordinates, window[0], window[1] - 1)
    cumidxs = (coords[None] // bw[:, None, None] - binshifts[:, None, None]
               + bincumstarts[:, None, None])                   # (F, N, C)
    alphas = (coords[None] % bw[:, None, None]) / bw[:, None, None]
    cumidxs = np.transpose(cumidxs, (1, 0, 2))                  # (N, F, C)
    alphas = np.transpose(alphas, (1, 0, 2))
    outs = []
    for ix, start, end in zip(regions_oi, indptr[:-1], indptr[1:]):
        ci = cumidxs[start:end]
        al = alphas[start:end]
        w0 = w[ix][ci.reshape(-1)].reshape(ci.shape + (D,))
        w1 = w[ix][ci.reshape(-1) + 1].reshape(ci.shape + (D,))
        outs.append(np.einsum('fbcd,fbc->fd', w0, 1 - al)
                    + np.einsum('fbcd,fbc->fd', w1, al))
    return np.concatenate(outs, axis=0)


if __name__ == "__main__":
    # Small config consistent with the module defaults (binwidths tile the
    # window, exactly as 100/200/500/... with (-100000, 100000) do).
    binwidths = (100, 200, 500)
    window = (-1000, 1000)
    n_regions = 4
    n_embedding_dimensions = 16

    nbins = (window[1] - window[0]) // np.asarray(binwidths) + 1   # [21, 11, 5]
    nbins_total = int(nbins.sum())                                 # 37

    key = jax.random.PRNGKey(0)
    k_w, k_c = jax.random.split(key)
    # The module's default weight_constructor is torch.zeros; random weights
    # make the correctness check non-trivial.
    w = jax.random.normal(
        k_w, (n_regions, nbins_total, n_embedding_dimensions), dtype=jnp.float32)

    N = 200
    coordinates = jax.random.randint(
        k_c, (N, 2), window[0] - 37, window[1] + 53, dtype=jnp.int32)  # exercises clamp
    indptr = np.asarray([0, 57, 130, 200], dtype=np.int64)             # ragged slices
    regions_oi = np.asarray([2, 0, 3], dtype=np.int64)

    out = multi_spline_binary_encoding(
        coordinates, indptr, regions_oi, w,
        binwidths=binwidths, window=window, tm=64)
    out = jax.block_until_ready(out)

    ref = multi_spline_ref(np.asarray(coordinates), indptr, regions_oi,
                           np.asarray(w), binwidths=binwidths, window=window)

    assert out.shape == (N, n_embedding_dimensions)
    # bf16 MXU inputs (hat + weights), f32 accumulation, vs float64 reference.
    np.testing.assert_allclose(np.asarray(out), ref, atol=5e-2, rtol=5e-2)
    print("KERNEL_OK")
</pallas_src>

<mosaic_0001>
module attributes {stable_mosaic.version = 11 : i64} {
  func.func @multi_spline_kernel(%arg0: i32, %arg1: memref<5xi32, #tpu.memory_space<smem>>, %arg2: memref<64x2xf32, #tpu.memory_space<vmem>>, %arg3: memref<2x128xf32, #tpu.memory_space<vmem>>, %arg4: memref<1x128x16xbf16, #tpu.memory_space<vmem>>, %arg5: memref<64x16xf32, #tpu.memory_space<vmem>>) attributes {dimension_semantics = [#tpu.dimension_semantics<parallel>], iteration_bounds = array<i64: 5>, scalar_prefetch = 1 : i64, scratch_operands = 0 : i64, tpu.core_type = #tpu.core_type<tc>, window_params = [{transform_indices = @transform_0, window_bounds = array<i64: 64, 2>}, {pipeline_mode = #tpu.pipeline_mode<synchronous>, transform_indices = @transform_1, window_bounds = array<i64: 2, 128>}, {transform_indices = @transform_2, window_bounds = array<i64: 1, 128, 16>}, {transform_indices = @transform_3, window_bounds = array<i64: 64, 16>}]} {
    %c0 = arith.constant 0 : index
    %c0_0 = arith.constant 0 : index
    %0 = vector.load %arg2[%c0, %c0_0] : memref<64x2xf32, #tpu.memory_space<vmem>>, vector<64x2xf32>
    %cst = arith.constant 0.000000e+00 : f32
    %1 = vector.broadcast %cst : f32 to vector<64x16xf32>
    %c0_i32 = arith.constant 0 : i32
    %c128_i32 = arith.constant 128 : i32
    %2 = arith.muli %c0_i32, %c128_i32 : i32
    %3 = tpu.assume_multiple %2, 128 : i32
    %c0_1 = arith.constant 0 : index
    %4 = arith.index_cast %3 : i32 to index
    %5 = vector.load %arg3[%c0_1, %4] : memref<2x128xf32, #tpu.memory_space<vmem>>, vector<2x128xf32>
    %6 = vector.extract_strided_slice %5 {offsets = [0, 0], sizes = [1, 128], strides = [1, 1]} : vector<2x128xf32> to vector<1x128xf32>
    %7 = vector.extract_strided_slice %5 {offsets = [1, 0], sizes = [1, 128], strides = [1, 1]} : vector<2x128xf32> to vector<1x128xf32>
    %8 = vector.extract_strided_slice %0 {offsets = [0, 0], sizes = [64, 1], strides = [1, 1]} : vector<64x2xf32> to vector<64x1xf32>
    %9 = vector.broadcast %8 : vector<64x1xf32> to vector<64x128xf32>
    %10 = vector.broadcast %6 : vector<1x128xf32> to vector<64x128xf32>
    %11 = arith.subf %9, %10 : vector<64x128xf32>
    %12 = math.absf %11 : vector<64x128xf32>
    %13 = vector.broadcast %7 : vector<1x128xf32> to vector<64x128xf32>
    %14 = arith.mulf %12, %13 : vector<64x128xf32>
    %cst_2 = arith.constant 1.000000e+00 : f32
    %15 = vector.broadcast %cst_2 : f32 to vector<64x128xf32>
    %16 = arith.subf %15, %14 : vector<64x128xf32>
    %cst_3 = arith.constant 0.000000e+00 : f32
    %17 = vector.broadcast %cst_3 : f32 to vector<64x128xf32>
    %18 = arith.maximumf %16, %17 : vector<64x128xf32>
    %19 = vector.extract_strided_slice %0 {offsets = [0, 1], sizes = [64, 1], strides = [1, 1]} : vector<64x2xf32> to vector<64x1xf32>
    %20 = vector.broadcast %19 : vector<64x1xf32> to vector<64x128xf32>
    %21 = vector.broadcast %6 : vector<1x128xf32> to vector<64x128xf32>
    %22 = arith.subf %20, %21 : vector<64x128xf32>
    %23 = math.absf %22 : vector<64x128xf32>
    %24 = vector.broadcast %7 : vector<1x128xf32> to vector<64x128xf32>
    %25 = arith.mulf %23, %24 : vector<64x128xf32>
    %cst_4 = arith.constant 1.000000e+00 : f32
    %26 = vector.broadcast %cst_4 : f32 to vector<64x128xf32>
    %27 = arith.subf %26, %25 : vector<64x128xf32>
    %cst_5 = arith.constant 0.000000e+00 : f32
    %28 = vector.broadcast %cst_5 : f32 to vector<64x128xf32>
    %29 = arith.maximumf %27, %28 : vector<64x128xf32>
    %30 = arith.addf %18, %29 : vector<64x128xf32>
    %c0_6 = arith.constant 0 : index
    %31 = arith.index_cast %3 : i32 to index
    %c0_7 = arith.constant 0 : index
    %32 = vector.load %arg4[%c0_6, %31, %c0_7] : memref<1x128x16xbf16, #tpu.memory_space<vmem>>, vector<1x128x16xbf16>
    %33 = vector.shape_cast %32 : vector<1x128x16xbf16> to vector<128x16xbf16>
    %34 = arith.truncf %30 : vector<64x128xf32> to vector<64x128xbf16>
    %cst_8 = arith.constant dense<0.000000e+00> : vector<64x16xf32>
    %35 = tpu.matmul %34, %33, %cst_8 {dimension_numbers = #tpu.dot_dimension_numbers<[1], [0], [0], [1], [0, 0, 1, 1], [], []>} : vector<64x128xbf16>, vector<128x16xbf16>, vector<64x16xf32> -> vector<64x16xf32>
    %36 = arith.addf %1, %35 : vector<64x16xf32>
    %c1_i32 = arith.constant 1 : i32
    %c0_9 = arith.constant 0 : index
    %c0_10 = arith.constant 0 : index
    %37 = vector.load %arg5[%c0_9, %c0_10] : memref<64x16xf32, #tpu.memory_space<vmem>>, vector<64x16xf32>
    tpu.vector_store %arg5[%c0_9, %c0_10], %36 {strides = array<i32>} : memref<64x16xf32, #tpu.memory_space<vmem>>, vector<64x16xf32>,
    return
  }
  func.func @transform_0(%arg0: i32, %arg1: memref<5xi32, #tpu.memory_space<smem>>) -> (i32, i32) {
    %c0_i32 = arith.constant 0 : i32
    %c0_i32_0 = arith.constant 0 : i32
    return %arg0, %c0_i32 : i32, i32
  }
  func.func @transform_1(%arg0: i32, %arg1: memref<5xi32, #tpu.memory_space<smem>>) -> (i32, i32) {
    %c0_i32 = arith.constant 0 : i32
    %c0_i32_0 = arith.constant 0 : i32
    %c0_i32_1 = arith.constant 0 : i32
    return %c0_i32, %c0_i32_0 : i32, i32
  }
  func.func @transform_2(%arg0: i32, %arg1: memref<5xi32, #tpu.memory_space<smem>>) -> (i32, i32, i32) {
    %0 = arith.index_cast %arg0 : i32 to index
    %1 = memref.load %arg1[%0] : memref<5xi32, #tpu.memory_space<smem>>
    %c0_i32 = arith.constant 0 : i32
    %c0_i32_0 = arith.constant 0 : i32
    %c0_i32_1 = arith.constant 0 : i32
    return %1, %c0_i32, %c0_i32_0 : i32, i32, i32
  }
  func.func @transform_3(%arg0: i32, %arg1: memref<5xi32, #tpu.memory_space<smem>>) -> (i32, i32) {
    %c0_i32 = arith.constant 0 : i32
    %c0_i32_0 = arith.constant 0 : i32
    return %arg0, %c0_i32 : i32, i32
  }
}

</mosaic_0001>

<bundles_post_ra>
// kernel: tpu_custom_call.1
= control target key start
LH: loop header
LB: loop body
LE: loop exit
PB: predicated region body
PF: predicated region fallthrough
CT: control target
= control target key end

     0   :  { %s842_s0 = inlined_call_operand.vmem [shape: s32[5], index: 0, kind: input, shape index: {}]   ;;  %s843_s1 = inlined_call_operand.vmem [shape: f32[320,2], index: 1, kind: input, shape index: {}]   ;;  %s844_s2 = inlined_call_operand.vmem [shape: f32[2,128], index: 2, kind: input, shape index: {}]   ;;  %s845_s3 = inlined_call_operand.vmem [shape: bf16[4,128,16], index: 3, kind: input, shape index: {}]   ;;  %s846_s4 = inlined_call_operand.vmem [shape: f32[320,16], index: 4, kind: output, shape index: {}]  }
   0x1   :  { %s9_s17 = sshll.u32 %s842_s0, 4  ;;  %s10_s17 = int_to_ptr.vmem [resolvable:$true] %s9_s17 }
   0x2   :  { %s695_s18 = scalar_lea.vmem %s10_s17, 16  ;;  %p700_p1 = scmp.lt.s32.totalorder %s10_s17, %s10_s17 }
   0x3   :  { %p696_p0 = scmp.ne.s32.totalorder %s10_s17, %s695_s18  ;;  %p701_p2 = scmp.lt.s32.totalorder %s695_s18, %s695_s18 }
   0x5   :  { %p702_p3 = por %p701_p2, %p700_p1 }
   0x7   :  { %p703_p4 = pnand %p702_p3, %p696_p0 }
   0x9   :  { %706 = shalt.err (!%p703_p4)  }
   0xa   :  { %s717_s19 = smov [#allocation3]  }
   0xb   :  { %12 = dma.vmem_to_smem %s10_s17, 16, %s717_s19, [#allocation2] }
   0xc   :  { %711 = dma.done.wait [#allocation2], 16 }
   0xd   :  { %712 = vsyncadd [#allocation2], 4294967280 }
   0xe   :  { %14 = sfence }
   0xf   :  { %s748_s20 = smov 0  }
  0x10 LB: > { %s596_s0 = sadd.s32 4294967295, %s715_s20   ;;  %p600_p5 = scmp.ge.s32.totalorder %s715_s20, 1  ;;  %s715_s20 = sphi %s748_s20, %s20_s20  }
  0x11   : > { %p159_p6 = scmp.lt.s32.totalorder %s715_s20, 6 }
  0x13   : > { %p160_p7 = pnand %p600_p5, %p159_p6 }
  0x14   : > { %s601_s21 = sshll.u32 (!%p160_p7), %s596_s0, 3  ;;  %s195_s22 = sld [smem:[#allocation3 + %s596_s0]] (!%p160_p7) }
  0x15   : > { %163 = sbr.rel (%p160_p7) target bundleno = 403 (0x193), region = 32  ;;  %p190_p8 = scmp.lt.s32.totalorder (!%p160_p7), %s601_s21, 39 }
  0x1a   : > { %v718_v0 = vmov 0   ;;  %s848_s21 = smov (!%p190_p8, %s601_s21), 39  ;;  %p196_p9 = scmp.lt.s32.totalorder %s195_s22, 3  ;;  %v719_v6 = vmov 1   ;;  %v258_v18 = vlaneseq  ;;  %v217_v21 = vld [vmem:[%s844_s2] sm:$0x3] }
  0x1b   : > { %682 = vset.pattern.permute.xlu1 %v718_v0  ;;  %681 = vset.pattern.permute.xlu0 %v718_v0  ;;  %s602_s23 = sshll.u32 %s848_s21, 3  ;;  %vm519_vm0 = vcmask 130048  }
  0x1c   : > { %s764_s26 = scalar_lea.vmem %s843_s1, %s602_s23  ;;  %s850_s22 = smov (!%p196_p9, %s195_s22), 3  ;;  %v259_v19 = vshrl.u32 %v258_v18, 7 }
  0x1d   : > { %v213_v1 = vld [vmem:[%s764_s26 + $0x20] sm:$0xff]  ;;  %v214_v3 = vld [vmem:[%s764_s26 + $0x28] sm:$0xff]  ;;  %v212_v5 = vld [vmem:[%s764_s26 + $0x18] sm:$0xff]  ;;  %s617_s27 = sshll.u32 %s850_s22, 6  ;;  %s206_s9 = scalar_lea.vmem %s846_s4, %s602_s23 }
  0x1e   : > { %v209_v2 = vld [vmem:[%s764_s26] sm:$0xff]  ;;  %240 = vperm.xlu1 %682, %v213_v1   ;;  %v210_v4 = vld [vmem:[%s764_s26 + $0x8] sm:$0xff]  ;;  %s774_s30 = scalar_lea.vmem %s845_s3, %s617_s27  ;;  %v211_v9 = vld [vmem:[%s764_s26 + $0x10] sm:$0xff]  ;;  %v260_v20 = vsub.s32 0, %v259_v19  ;;  %v280_v27 = vsub.s32 1, %v259_v19 }
  0x1f   : > { %220 = vperm.xlu0 %681, %v209_v2   ;;  %v687_v7 = vld [vmem:[%s774_s30 + $0x38] sm:$0xff]   ;;  %v688_v8 = vld [vmem:[%s774_s30 + $0x30] sm:$0xff]   ;;  %v689_v10 = vld [vmem:[%s774_s30 + $0x28] sm:$0xff]  }
  0x20   : > { %630 = vmatprep.subr.bf16.mxu0 %v687_v7  ;;  %654 = vmatprep.subr.bf16.mxu1 %v687_v7  ;;  %v215_v11 = vld [vmem:[%s764_s26 + $0x30] sm:$0xff]  ;;  %v690_v12 = vld [vmem:[%s774_s30 + $0x20] sm:$0xff]   ;;  %v216_v13 = vld [vmem:[%s764_s26 + $0x38] sm:$0xff]  ;;  %v790_v24 = vrot.slane %v217_v21, %v260_v20  ;;  %v794_v32 = vrot.slane %v217_v21, %v280_v27 }
  0x21   : > { %631 = vmatpush3.bf16.msra.mxu0 %v687_v7  ;;  %662 = vmatpush3.bf16.msra.mxu1 %v687_v7  ;;  %v691_v14 = vld [vmem:[%s774_s30 + $0x18] sm:$0xff]   ;;  %v692_v15 = vld [vmem:[%s774_s30 + $0x10] sm:$0xff]   ;;  %v693_v16 = vld [vmem:[%s774_s30 + $0x8] sm:$0xff]  }
  0x22   : > { %245 = vperm.xlu1 %682, %v214_v3   ;;  %632 = vmatprep.subr.bf16.mxu0 %v688_v8  ;;  %v694_v17 = vld [vmem:[%s774_s30] sm:$0xff]  }
  0x23   : > { %225 = vperm.xlu0 %681, %v210_v4   ;;  %655 = vmatprep.subr.bf16.mxu1 %v688_v8 }
  0x25   : > { %633 = vmatpush3.bf16.msra.mxu0 %v688_v8  ;;  %663 = vmatpush3.bf16.msra.mxu1 %v688_v8 }
  0x26   : > { %683 = vset.pattern.permute.xlu1 %v719_v6  ;;  %634 = vmatprep.subr.bf16.mxu0 %v689_v10 }
  0x27   : > { %235 = vperm.xlu0 %681, %v212_v5   ;;  %311 = vperm.xlu1 %683, %v210_v4  }
  0x28   : > { %656 = vmatprep.subr.bf16.mxu1 %v689_v10 }
  0x29   : > { %635 = vmatpush3.bf16.msra.mxu0 %v689_v10  ;;  %664 = vmatpush3.bf16.msra.mxu1 %v689_v10 }
  0x2a   : > { %636 = vmatprep.subr.bf16.mxu0 %v690_v12  ;;  %657 = vmatprep.subr.bf16.mxu1 %v690_v12 }
  0x2b   : > { %685 = vset.pattern.permute.xlu0 %v719_v6  ;;  %323 = vperm.xlu1 %683, %v213_v1  }
  0x2c   : > { %307 = vperm.xlu0 %685, %v209_v2  }
  0x2d   : > { %637 = vmatpush3.bf16.msra.mxu0 %v690_v12  ;;  %665 = vmatpush3.bf16.msra.mxu1 %v690_v12 }
  0x2e   : > { %638 = vmatprep.subr.bf16.mxu0 %v691_v14  ;;  %658 = vmatprep.subr.bf16.mxu1 %v691_v14 }
  0x2f   : > { %684 = vset.pattern.permute.xlu1 %v718_v0 }
  0x30   : > { %327 = vperm.xlu0 %685, %v214_v3   ;;  %230 = vperm.xlu1 %684, %v211_v9  }
  0x31   : > { %639 = vmatpush3.bf16.msra.mxu0 %v691_v14  ;;  %666 = vmatpush3.bf16.msra.mxu1 %v691_v14 }
  0x32   : > { %640 = vmatprep.subr.bf16.mxu0 %v692_v15  ;;  %659 = vmatprep.subr.bf16.mxu1 %v692_v15 }
  0x34   : > { %315 = vperm.xlu0 %685, %v211_v9   ;;  %250 = vperm.xlu1 %684, %v215_v11  }
  0x35   : > { %641 = vmatpush3.bf16.msra.mxu0 %v692_v15  ;;  %667 = vmatpush3.bf16.msra.mxu1 %v692_v15 }
  0x36   : > { %642 = vmatprep.subr.bf16.mxu0 %v693_v16  ;;  %660 = vmatprep.subr.bf16.mxu1 %v693_v16 }
  0x38   : > { %335 = vperm.xlu0 %685, %v216_v13   ;;  %255 = vperm.xlu1 %684, %v216_v13  }
  0x39   : > { %643 = vmatpush3.bf16.msra.mxu0 %v693_v16  ;;  %668 = vmatpush3.bf16.msra.mxu1 %v693_v16 }
  0x3a   : > { %644 = vmatprep.subr.bf16.mxu0 %v694_v17  ;;  %661 = vmatprep.subr.bf16.mxu1 %v694_v17 }
  0x3c   : > { %686 = vset.pattern.permute.xlu1 %v719_v6 }
  0x3d   : > { %319 = vperm.xlu1 %686, %v212_v5   ;;  %645 = vmatpush3.bf16.msra.mxu0 %v694_v17 }
  0x3e   : > { %669 = vmatpush3.bf16.msra.mxu1 %v694_v17 }
  0x41   : > { %331 = vperm.xlu1 %686, %v215_v11  }
  0x99   : > { %v241_v22 = vpop.permute.xlu1 %240 }
  0x9a   : > { %v221_v23 = vpop.permute.xlu0 %220  ;;  %v266_v33 = vsub.f32 %v241_v22, %v790_v24 }
  0x9b   : > { %v262_v28 = vsub.f32 %v221_v23, %v790_v24 }
  0x9c   : > { %v274_v40 = vand.u32 2147483647, %v266_v33 }
  0x9d   : > { %v246_v25 = vpop.permute.xlu1 %245  ;;  %v270_v34 = vand.u32 2147483647, %v262_v28 }
  0x9e   : > { %v226_v26 = vpop.permute.xlu0 %225  ;;  %v267_v36 = vsub.f32 %v246_v25, %v790_v24  ;;  %v286_v52 = vmul.f32 %v794_v32, %v274_v40 }
  0x9f   : > { %v263_v29 = vsub.f32 %v226_v26, %v790_v24  ;;  %v282_v41 = vmul.f32 %v794_v32, %v270_v34 }
  0xa0   : > { %v275_v44 = vand.u32 2147483647, %v267_v36  ;;  %v294_v1 = vsub.f32 1.0, %v286_v52 }
  0xa1   : > { %v271_v30 = vand.u32 2147483647, %v263_v29  ;;  %v290_v53 = vsub.f32 1.0, %v282_v41 }
  0xa2   : > { %v236_v31 = vpop.permute.xlu0 %235  ;;  %v312_v35 = vpop.permute.xlu1 %311  ;;  %v287_v55 = vmul.f32 %v794_v32, %v275_v44  ;;  %v302_v17 = vmax.f32 %v294_v1, 0.0 }
  0xa3   : > { %v339_v37 = vsub.f32 %v312_v35, %v790_v24  ;;  %v283_v38 = vmul.f32 %v794_v32, %v271_v30  ;;  %v298_v3 = vmax.f32 %v290_v53, 0.0  ;;  %v265_v9 = vsub.f32 %v236_v31, %v790_v24 }
  0xa4   : > { %v295_v4 = vsub.f32 1.0, %v287_v55 }
  0xa5   : > { %v347_v39 = vand.u32 2147483647, %v339_v37  ;;  %v291_v48 = vsub.f32 1.0, %v283_v38  ;;  %v273_v26 = vand.u32 2147483647, %v265_v9 }
  0xa6   : > { %v324_v42 = vpop.permute.xlu1 %323  ;;  %v303_v21 = vmax.f32 %v295_v4, 0.0 }
  0xa7   : > { %v308_v43 = vpop.permute.xlu0 %307  ;;  %v355_v45 = vmul.f32 %v347_v39, %v794_v32  ;;  %v342_v46 = vsub.f32 %v324_v42, %v790_v24  ;;  %v299_v60 = vmax.f32 %v291_v48, 0.0  ;;  %v285_v37 = vmul.f32 %v794_v32, %v273_v26 }
  0xa8   : > { %v338_v47 = vsub.f32 %v308_v43, %v790_v24 }
  0xa9   : > { %v363_v49 = vsub.f32 1.0, %v355_v45  ;;  %v350_v50 = vand.u32 2147483647, %v342_v46  ;;  %v293_v46 = vsub.f32 1.0, %v285_v37 }
  0xaa   : > { %v346_v51 = vand.u32 2147483647, %v338_v47 }
  0xab   : > { %v328_v54 = vpop.permute.xlu0 %327  ;;  %v358_v56 = vmul.f32 %v350_v50, %v794_v32  ;;  %v231_v59 = vpop.permute.xlu1 %230  ;;  %v371_v0 = vmax.f32 %v363_v49, 0.0 }
  0xac   : > { %v354_v57 = vmul.f32 %v346_v51, %v794_v32  ;;  %v343_v58 = vsub.f32 %v328_v54, %v790_v24  ;;  %v264_v10 = vsub.f32 %v231_v59, %v790_v24 }
  0xad   : > { %v366_v61 = vsub.f32 1.0, %v358_v56  ;;  %v379_v13 = vadd.f32 %v371_v0, %v299_v60  ;;  %v301_v56 = vmax.f32 %v293_v46, 0.0 }
  0xae   : > { %v362_v62 = vsub.f32 1.0, %v354_v57  ;;  %v351_v63 = vand.u32 2147483647, %v343_v58  ;;  %v272_v23 = vand.u32 2147483647, %v264_v10 }
  0xaf   : > { %v316_v2 = vpop.permute.xlu0 %315  ;;  %v251_v7 = vpop.permute.xlu1 %250  ;;  %v374_v14 = vmax.f32 %v366_v61, 0.0 }
  0xb0   : > { %v359_v5 = vmul.f32 %v351_v63, %v794_v32  ;;  %v340_v6 = vsub.f32 %v316_v2, %v790_v24  ;;  %v370_v8 = vmax.f32 %v362_v62, 0.0  ;;  %v268_v27 = vsub.f32 %v251_v7, %v790_v24 }
  0xb1   : > { %v382_v28 = vadd.f32 %v374_v14, %v302_v17  ;;  %v284_v35 = vmul.f32 %v794_v32, %v272_v23 }
  0xb2   : > { %v367_v11 = vsub.f32 1.0, %v359_v5  ;;  %v378_v12 = vadd.f32 %v370_v8, %v298_v3  ;;  %v348_v15 = vand.u32 2147483647, %v340_v6  ;;  %v276_v38 = vand.u32 2147483647, %v268_v27 }
  0xb3   : > { %v336_v16 = vpop.permute.xlu0 %335  ;;  %v256_v19 = vpop.permute.xlu1 %255  ;;  %v292_v44 = vsub.f32 1.0, %v284_v35 }
  0xb4   : > { %v345_v18 = vsub.f32 %v336_v16, %v790_v24  ;;  %v402_v20 = vpack.c.bf16 %v379_v13, %v378_v12  ;;  %v375_v22 = vmax.f32 %v367_v11, 0.0  ;;  %v269_v25 = vsub.f32 %v256_v19, %v790_v24 }
  0xb5   : > { %v356_v30 = vmul.f32 %v348_v15, %v794_v32  ;;  %v288_v47 = vmul.f32 %v794_v32, %v276_v38  ;;  %v300_v55 = vmax.f32 %v292_v44, 0.0 }
  0xb6   : > { %646 = vmatprep.mubr.bf16.mxu0 %v402_v20  ;;  %v383_v29 = vadd.f32 %v375_v22, %v303_v21  ;;  %v353_v31 = vand.u32 2147483647, %v345_v18  ;;  %v277_v33 = vand.u32 2147483647, %v269_v25 }
  0xb7   : > { %v364_v40 = vsub.f32 1.0, %v356_v30  ;;  %v296_v57 = vsub.f32 1.0, %v288_v47 }
  0xb8   : > { %v404_v34 = vpack.c.bf16 %v383_v29, %v382_v28  ;;  %v320_v36 = vpop.permute.xlu1 %319  ;;  %v361_v41 = vmul.f32 %v353_v31, %v794_v32  ;;  %v289_v42 = vmul.f32 %v794_v32, %v277_v33 }
  0xb9   : > { %v341_v39 = vsub.f32 %v320_v36, %v790_v24  ;;  %v372_v50 = vmax.f32 %v364_v40, 0.0  ;;  %v304_v1 = vmax.f32 %v296_v57, 0.0 }
  0xba   : > { %650 = vmatprep.mubr.bf16.mxu1 %v404_v34  ;;  %v369_v51 = vsub.f32 1.0, %v361_v41  ;;  %v297_v52 = vsub.f32 1.0, %v289_v42 }
  0xbb   : > { %v349_v43 = vand.u32 2147483647, %v341_v39  ;;  %v380_v60 = vadd.f32 %v372_v50, %v300_v55 }
  0xbc   : > { %v332_v45 = vpop.permute.xlu1 %331  ;;  %v377_v61 = vmax.f32 %v369_v51, 0.0  ;;  %v305_v62 = vmax.f32 %v297_v52, 0.0 }
  0xbd   : > { %v357_v48 = vmul.f32 %v349_v43, %v794_v32  ;;  %v344_v49 = vsub.f32 %v332_v45, %v790_v24 }
  0xbe   : > { %v385_v4 = vadd.f32 %v377_v61, %v305_v62 }
  0xbf   : > { %v365_v53 = vsub.f32 1.0, %v357_v48  ;;  %v352_v54 = vand.u32 2147483647, %v344_v49 }
  0xc1   : > { %v373_v58 = vmax.f32 %v365_v53, 0.0  ;;  %v360_v59 = vmul.f32 %v352_v54, %v794_v32 }
  0xc3   : > { %v368_v63 = vsub.f32 1.0, %v360_v59  ;;  %v381_v0 = vadd.f32 %v373_v58, %v301_v56 }
  0xc5   : > { %v376_v2 = vmax.f32 %v368_v63, 0.0  ;;  %v403_v24 = vpack.c.bf16 %v381_v0, %v380_v60 }
  0xc7   : > { %647 = vmatmul.mubr.bf16.vlgmr.msra.gmra.mxu0 %v403_v24  ;;  %v384_v3 = vadd.f32 %v376_v2, %v304_v1 }
  0xc9   : > { %v405_v5 = vpack.c.bf16 %v385_v4, %v384_v3 }
  0xcb   : > { %651 = vmatmul.mubr.bf16.vlgmr.msra.gmra.mxu1 %v405_v5 }
 0x187   : > { %v648_v32 = vpop.f32.mrf.mxu0 }
 0x188   : > { %522 = vst.msk [vmem:[%s206_s9 + $0x10] sm:$0xff] %vm519_vm0, %v648_v32 }
 0x189   : > { %v488_v6 = vpop.f32.mrf.mxu0 }
 0x18a   : > { %520 = vst.msk [vmem:[%s206_s9] sm:$0xff] %vm519_vm0, %v488_v6 }
 0x18b   : > { %v649_v7 = vpop.f32.mrf.mxu0  ;;  %v652_v8 = vpop.f32.mrf.mxu1 }
 0x18c   : > { %523 = vst.msk [vmem:[%s206_s9 + $0x18] sm:$0xff] %vm519_vm0, %v649_v7  ;;  %526 = vst.msk [vmem:[%s206_s9 + $0x30] sm:$0xff] %vm519_vm0, %v652_v8 }
 0x18d   : > { %v491_v9 = vpop.f32.mrf.mxu0  ;;  %v504_v10 = vpop.f32.mrf.mxu1 }
 0x18e   : > { %521 = vst.msk [vmem:[%s206_s9 + $0x8] sm:$0xff] %vm519_vm0, %v491_v9  ;;  %524 = vst.msk [vmem:[%s206_s9 + $0x20] sm:$0xff] %vm519_vm0, %v504_v10 }
 0x18f   : > { %v653_v11 = vpop.f32.mrf.mxu1 }
 0x190   : > { %527 = vst.msk [vmem:[%s206_s9 + $0x38] sm:$0xff] %vm519_vm0, %v653_v11 }
 0x191   : > { %v507_v12 = vpop.f32.mrf.mxu1 }
 0x192   : > { %525 = vst.msk [vmem:[%s206_s9 + $0x28] sm:$0xff] %vm519_vm0, %v507_v12 }
 0x193 PF: > { %s20_s20 = sadd.s32 1, %s715_s20  }
 0x194   : > { %p17_p10 = scmp.ge.s32.totalorder %s20_s20, 7  }
 0x196   :  { %19 = sbr.rel (!%p17_p10) target bundleno = 16 (0x10), region = 65 }

</bundles_post_ra>
